<compile_context>
chip_gen: v7x
topology: tpu7x:2x2x1
jax: 0.10.0
libtpu: 0.0.40
codegen_flags: <defaults>
</compile_context>

<pallas_src>
import functools
import math

import jax
import jax.numpy as jnp
from jax.experimental import pallas as pl
from jax.experimental.pallas import tpu as pltpu


# ----------------------------------------------------------------------------
# Pallas RMSNorm kernel
# ----------------------------------------------------------------------------

def _rmsnorm_kernel(x_ref, w_ref, o_ref, *, eps: float):
    # Square + mean-reduce over the last axis (XLU), rsqrt (EUP), scale (VPU).
    x32 = x_ref[...].astype(jnp.float32)                        # x.float()
    ms = jnp.mean(x32 * x32, axis=-1, keepdims=True)            # mean(x^2, -1)
    inv = jax.lax.rsqrt(ms + eps)                               # rsqrt(. + eps)
    w32 = w_ref[...].astype(jnp.float32)
    # Fused epilogue: single downcast at the end (no bf16 round-trip).
    o_ref[...] = (x32 * inv * w32).astype(o_ref.dtype)


def _round_up(x: int, m: int) -> int:
    return -(-x // m) * m


def _sublane_multiple(dtype) -> int:
    itemsize = jnp.dtype(dtype).itemsize
    if itemsize >= 4:
        return 8
    if itemsize == 2:
        return 16
    return 32


@functools.lru_cache(maxsize=1)
def _tpu_defaults():
    """Best-effort hardware query -> (num_cores, block_budget, vmem_limit)."""
    vmem_bytes = 128 * 1024 * 1024
    num_cores = 1
    try:
        info = pltpu.get_tpu_info()
        v = getattr(info, "vmem_capacity_bytes", None)
        if v:
            vmem_bytes = int(v)
        for name in ("num_cores", "core_count", "tensorcores_per_chip",
                     "num_tensorcores", "cores_per_chip"):
            c = getattr(info, name, None)
            if c:
                num_cores = int(c)
                break
    except Exception:
        pass
    if vmem_bytes <= 64 * 1024 * 1024:
        # v7x-class: only 64 MiB physical VMEM per TensorCore.
        block_budget = 24 * 1024 * 1024
        vmem_limit = 48 * 1024 * 1024
    else:
        # v5e / v6e: 128 MiB physical VMEM -> larger tiles, raise scoped limit
        # (v5e default scoped VMEM is only 16 MiB).
        block_budget = 40 * 1024 * 1024
        vmem_limit = 80 * 1024 * 1024
    return num_cores, block_budget, vmem_limit


def _choose_row_tile(rows: int, dim: int, x_dtype, out_dtype, *,
                     budget: int, num_cores: int, target: int = 1024) -> int:
    """Largest VMEM-safe row tile (multiple of the sublane packing)."""
    sub = _sublane_multiple(x_dtype)
    if rows < sub:
        return rows  # block covering the full (tiny) row extent is always legal
    xb = jnp.dtype(x_dtype).itemsize
    ob = jnp.dtype(out_dtype).itemsize
    # Double-buffered input + output blocks, plus ~8 B/elem of live f32
    # temporaries (x32 persists across the reduce/scale passes + the product).
    per_row = dim * (2 * xb + 2 * ob + 8)
    max_rows = max(sub, (budget // per_row) // sub * sub)
    tile = min(target, max_rows)
    # Never larger than needed to cover all rows.
    tile = min(tile, _round_up(rows, sub))
    # Guarantee >= num_cores grid steps so "parallel" shards rows across TCs.
    if num_cores > 1:
        tile = min(tile, _round_up(-(-rows // num_cores), sub))
    return max(sub, (tile // sub) * sub)


def rmsnorm(x, weight, eps: float = 1e-5, *, row_tile: int | None = None,
            block_budget_bytes: int | None = None,
            vmem_limit_bytes: int | None = None):
    """x: (..., dim); weight: (dim,) or None. Returns x.shape with x.dtype."""
    orig_shape = x.shape
    dim = orig_shape[-1]
    rows = 1
    for s in orig_shape[:-1]:
        rows *= int(s)
    x2d = x.reshape(rows, dim)

    out_dtype = x.dtype
    if weight is None:
        weight = jnp.ones((dim,), dtype=x.dtype)
    # Weight cast to x.dtype (keeps bf16 outputs bf16; documented divergence
    # from PyTorch promotion when x is bf16 and weight is f32).
    w2d = weight.astype(x.dtype).reshape(1, dim)

    num_cores, default_budget, default_limit = _tpu_defaults()
    budget = block_budget_bytes if block_budget_bytes is not None else default_budget
    vmem_limit = vmem_limit_bytes if vmem_limit_bytes is not None else default_limit

    if row_tile is None:
        row_tile = _choose_row_tile(rows, dim, x.dtype, out_dtype,
                                    budget=budget, num_cores=num_cores)

    # Ragged rows: no wrapper pad/slice; Pallas masks the partial last block.
    grid = (pl.cdiv(rows, row_tile),)

    kernel = functools.partial(_rmsnorm_kernel, eps=eps)
    out2d = pl.pallas_call(
        kernel,
        out_shape=jax.ShapeDtypeStruct((rows, dim), out_dtype),
        grid_spec=pltpu.PrefetchScalarGridSpec(
            num_scalar_prefetch=0,
            grid=grid,
            in_specs=[
                pl.BlockSpec((row_tile, dim), lambda i: (i, 0)),   # x rows
                pl.BlockSpec((1, dim), lambda i: (0, 0)),          # weight (resident)
            ],
            out_specs=pl.BlockSpec((row_tile, dim), lambda i: (i, 0)),
        ),
        compiler_params=pltpu.CompilerParams(
            dimension_semantics=("parallel",),
            vmem_limit_bytes=vmem_limit,
        ),
    )(x2d, w2d)

    return out2d.reshape(orig_shape)


def rmsnorm_ref(x, weight, eps: float = 1e-5):
    x32 = x.astype(jnp.float32)
    normed = x32 * jax.lax.rsqrt(jnp.mean(x32 * x32, axis=-1, keepdims=True) + eps)
    out = normed.astype(x.dtype)
    if weight is not None:
        out = out * weight.astype(x.dtype)
    return out


# ----------------------------------------------------------------------------
# LLaMA forward (plain JAX around the Pallas RMSNorm)
# TODO(synk): attention / MLP / embedding / lm_head matmuls are plain XLA ops
#             (jnp.einsum / @), not bespoke Pallas kernels.
# ----------------------------------------------------------------------------

def _rope_freqs(T: int, head_dim: int):
    inv_freq = 1.0 / (10000.0 ** (jnp.arange(0, head_dim, 2, dtype=jnp.float32) / head_dim))
    seq = jnp.arange(T, dtype=jnp.float32)
    freqs = jnp.einsum("i,j->ij", seq, inv_freq)
    return jnp.concatenate([freqs, freqs], axis=-1)[None, None]  # (1,1,T,head_dim)


def _rotate_half(x):
    d = x.shape[-1] // 2
    x1, x2 = x[..., :d], x[..., d:]
    return jnp.concatenate([-x2, x1], axis=-1)


def _apply_rotary(t, freqs):
    rot_dim = freqs.shape[-1]
    t_rot, t_pass = t[..., :rot_dim], t[..., rot_dim:]
    t_rot = t_rot * jnp.cos(freqs) + _rotate_half(t_rot) * jnp.sin(freqs)
    return jnp.concatenate([t_rot, t_pass], axis=-1)


def _attention(x, p, n_head):
    B, T, C = x.shape
    hd = C // n_head
    qkv = x @ p["c_attn_w"].T                        # bias=False
    q, k, v = jnp.split(qkv, 3, axis=2)

    def split_heads(t):
        return t.reshape(B, T, n_head, hd).transpose(0, 2, 1, 3)  # (B,nh,T,hd)

    q, k, v = split_heads(q), split_heads(k), split_heads(v)
    freqs = _rope_freqs(T, hd)
    q = _apply_rotary(q, freqs)
    k = _apply_rotary(k, freqs)

    att = jnp.einsum("bhqd,bhkd->bhqk", q, k) * (1.0 / math.sqrt(hd))
    causal = jnp.tril(jnp.ones((T, T), dtype=bool))
    att = jnp.where(causal[None, None], att, -jnp.inf)
    att = jax.nn.softmax(att, axis=-1)
    y = jnp.einsum("bhqk,bhkd->bhqd", att, v)
    y = y.transpose(0, 2, 1, 3).reshape(B, T, C)
    return y @ p["c_proj_w"].T


def _mlp(x, p):
    h = x @ p["fc1_w"].T
    g = x @ p["fc2_w"].T
    return (jax.nn.silu(g) * h) @ p["c_proj_w"].T


def init_llama_params(key, cfg):
    C, V, L = cfg["n_embd"], cfg["vocab_size"], cfg["n_layer"]
    hidden = 256 * ((int(8 * C / 3) + 255) // 256)
    std = 0.02
    proj_std = 0.02 / math.sqrt(2 * L)
    keys = jax.random.split(key, 1 + 5 * L)
    params = {
        "wte": std * jax.random.normal(keys[0], (V, C), jnp.float32),
        "ln_f_w": jnp.ones((C,), jnp.float32),
        "layers": [],
    }
    ki = 1
    for _ in range(L):
        params["layers"].append({
            "ln_1_w": jnp.ones((C,), jnp.float32),
            "ln_2_w": jnp.ones((C,), jnp.float32),
            "attn": {
                "c_attn_w": std * jax.random.normal(keys[ki], (3 * C, C), jnp.float32),
                "c_proj_w": proj_std * jax.random.normal(keys[ki + 1], (C, C), jnp.float32),
            },
            "mlp": {
                "fc1_w": std * jax.random.normal(keys[ki + 2], (hidden, C), jnp.float32),
                "fc2_w": std * jax.random.normal(keys[ki + 3], (hidden, C), jnp.float32),
                "c_proj_w": proj_std * jax.random.normal(keys[ki + 4], (C, hidden), jnp.float32),
            },
        })
        ki += 5
    return params


def llama_forward(params, idx, cfg, *, norm_fn, targets=None, eps=1e-5):
    assert idx.shape[1] <= cfg["block_size"]
    x = params["wte"][idx]                      # token embedding (B,T,C)
    # TODO(synk): dropout layers omitted (config.dropout == 0.0 -> identity).
    for layer in params["layers"]:
        x = x + _attention(norm_fn(x, layer["ln_1_w"], eps), layer["attn"], cfg["n_head"])
        x = x + _mlp(norm_fn(x, layer["ln_2_w"], eps), layer["mlp"])
    x = norm_fn(x, params["ln_f_w"], eps)

    if targets is not None:
        logits = x @ params["wte"].T            # tied lm_head
        logp = jax.nn.log_softmax(logits.astype(jnp.float32), axis=-1)
        t = targets.reshape(-1)
        nll = -jnp.take_along_axis(logp.reshape(-1, logits.shape[-1]),
                                   jnp.maximum(t, 0)[:, None], axis=1)[:, 0]
        valid = (t != -1).astype(jnp.float32)
        loss = jnp.sum(nll * valid) / jnp.maximum(jnp.sum(valid), 1.0)
        return logits, loss

    logits = x[:, -1:, :] @ params["wte"].T     # inference: last position only
    return logits, None


# ----------------------------------------------------------------------------
# Tests
# ----------------------------------------------------------------------------

if __name__ == "__main__":
    key = jax.random.PRNGKey(0)
    k0, k1, k2, k3, k4 = jax.random.split(key, 5)

    # --- Standalone RMSNorm kernel checks ---
    dim = 128
    x = jax.random.normal(k0, (2, 8, dim), dtype=jnp.float32)
    w = jnp.ones((dim,), dtype=jnp.float32)
    out = jax.block_until_ready(rmsnorm(x, w, eps=1e-5))
    assert out.shape == x.shape and out.dtype == x.dtype
    assert jnp.allclose(out, rmsnorm_ref(x, w, eps=1e-5), atol=1e-5, rtol=1e-5)

    # Ragged rows (rows=15): masked partial last block, no wrapper pad/slice.
    x_r = jax.random.normal(k1, (3, 5, dim), dtype=jnp.float32)
    w_r = 1.0 + 0.01 * jnp.arange(dim, dtype=jnp.float32)
    out_r = jax.block_until_ready(rmsnorm(x_r, w_r, eps=1e-5))
    assert jnp.allclose(out_r, rmsnorm_ref(x_r, w_r, eps=1e-5), atol=1e-5, rtol=1e-5)

    # bf16 activations: output stays bf16 (weight downcast in wrapper).
    x_bf = jax.random.normal(k2, (4, 16, dim), dtype=jnp.bfloat16)
    out_bf = jax.block_until_ready(rmsnorm(x_bf, w_r, eps=1e-5))
    assert out_bf.dtype == jnp.bfloat16
    assert jnp.allclose(out_bf.astype(jnp.float32),
                        rmsnorm_ref(x_bf, w_r, eps=1e-5).astype(jnp.float32),
                        atol=2e-2, rtol=2e-2)

    # --- Full LLaMA forward using the Pallas RMSNorm ---
    cfg = dict(vocab_size=64, block_size=16, n_layer=2, n_head=2, n_embd=32,
               dropout=0.0, bias=False)
    params = init_llama_params(k3, cfg)
    idx = jax.random.randint(k4, (2, 8), 0, cfg["vocab_size"])

    logits_kernel, _ = llama_forward(params, idx, cfg, norm_fn=rmsnorm)
    logits_kernel = jax.block_until_ready(logits_kernel)
    logits_ref, _ = llama_forward(params, idx, cfg, norm_fn=rmsnorm_ref)
    assert logits_kernel.shape == (2, 1, cfg["vocab_size"])
    assert jnp.allclose(logits_kernel, logits_ref, atol=1e-4, rtol=1e-4)

    # Training path: loss finite and matches the reference-norm path.
    targets = jax.random.randint(k4, (2, 8), 0, cfg["vocab_size"])
    _, loss_k = llama_forward(params, idx, cfg, norm_fn=rmsnorm, targets=targets)
    _, loss_r = llama_forward(params, idx, cfg, norm_fn=rmsnorm_ref, targets=targets)
    loss_k = jax.block_until_ready(loss_k)
    assert bool(jnp.isfinite(loss_k))
    assert jnp.allclose(loss_k, loss_r, atol=1e-4, rtol=1e-4)

    print("KERNEL_OK")
</pallas_src>

<mosaic_0001>
module attributes {stable_mosaic.version = 11 : i64} {
  func.func @_rmsnorm_kernel(%arg0: i32, %arg1: memref<16x128xf32, #tpu.memory_space<vmem>>, %arg2: memref<1x128xf32, #tpu.memory_space<vmem>>, %arg3: memref<16x128xf32, #tpu.memory_space<vmem>>) attributes {dimension_semantics = [#tpu.dimension_semantics<parallel>], iteration_bounds = array<i64: 1>, scalar_prefetch = 0 : i64, scratch_operands = 0 : i64, tpu.core_type = #tpu.core_type<tc>, window_params = [{transform_indices = @transform_0, window_bounds = array<i64: 16, 128>}, {pipeline_mode = #tpu.pipeline_mode<synchronous>, transform_indices = @transform_1, window_bounds = array<i64: 1, 128>}, {transform_indices = @transform_2, window_bounds = array<i64: 16, 128>}]} {
    %c0 = arith.constant 0 : index
    %c0_0 = arith.constant 0 : index
    %0 = vector.load %arg1[%c0, %c0_0] : memref<16x128xf32, #tpu.memory_space<vmem>>, vector<16x128xf32>
    %1 = arith.mulf %0, %0 : vector<16x128xf32>
    %cst = arith.constant dense<0.000000e+00> : vector<16xf32>
    %2 = vector.multi_reduction <add>, %1, %cst [1] : vector<16x128xf32> to vector<16xf32>
    %3 = vector.shape_cast %2 : vector<16xf32> to vector<16x1xf32>
    %cst_1 = arith.constant 1.280000e+02 : f32
    %4 = vector.broadcast %cst_1 : f32 to vector<16x1xf32>
    %5 = arith.divf %3, %4 : vector<16x1xf32>
    %cst_2 = arith.constant 9.99999974E-6 : f32
    %6 = vector.broadcast %cst_2 : f32 to vector<16x1xf32>
    %7 = arith.addf %5, %6 : vector<16x1xf32>
    %8 = math.rsqrt %7 : vector<16x1xf32>
    %c0_3 = arith.constant 0 : index
    %c0_4 = arith.constant 0 : index
    %9 = vector.load %arg2[%c0_3, %c0_4] : memref<1x128xf32, #tpu.memory_space<vmem>>, vector<1x128xf32>
    %10 = vector.broadcast %8 : vector<16x1xf32> to vector<16x128xf32>
    %11 = arith.mulf %0, %10 : vector<16x128xf32>
    %12 = vector.broadcast %9 : vector<1x128xf32> to vector<16x128xf32>
    %13 = arith.mulf %11, %12 : vector<16x128xf32>
    %c0_5 = arith.constant 0 : index
    %c0_6 = arith.constant 0 : index
    %14 = vector.load %arg3[%c0_5, %c0_6] : memref<16x128xf32, #tpu.memory_space<vmem>>, vector<16x128xf32>
    tpu.vector_store %arg3[%c0_5, %c0_6], %13 {strides = array<i32>} : memref<16x128xf32, #tpu.memory_space<vmem>>, vector<16x128xf32>,
    return
  }
  func.func @transform_0(%arg0: i32) -> (i32, i32) {
    %c0_i32 = arith.constant 0 : i32
    %c0_i32_0 = arith.constant 0 : i32
    return %arg0, %c0_i32 : i32, i32
  }
  func.func @transform_1(%arg0: i32) -> (i32, i32) {
    %c0_i32 = arith.constant 0 : i32
    %c0_i32_0 = arith.constant 0 : i32
    %c0_i32_1 = arith.constant 0 : i32
    return %c0_i32, %c0_i32_0 : i32, i32
  }
  func.func @transform_2(%arg0: i32) -> (i32, i32) {
    %c0_i32 = arith.constant 0 : i32
    %c0_i32_0 = arith.constant 0 : i32
    return %arg0, %c0_i32 : i32, i32
  }
}

</mosaic_0001>

<bundles_post_ra>
// kernel: tpu_custom_call.1
= control target key start
LH: loop header
LB: loop body
LE: loop exit
PB: predicated region body
PF: predicated region fallthrough
CT: control target
= control target key end

     0   :  { %7 = vsyncpa [#allocation3], 0  ;;  %s228_s0 = inlined_call_operand.hbm [shape: f32[16,128], index: 0, kind: input, shape index: {}]   ;;  %s229_s1 = inlined_call_operand.hbm [shape: f32[1,128], index: 1, kind: input, shape index: {}]   ;;  %s230_s2 = inlined_call_operand.hbm [shape: f32[16,128], index: 2, kind: output, shape index: {}]  }
   0x1   :  { %8 = vsyncpa [#allocation6], 0 }
   0x2   :  { %9 = vsyncpa [#allocation4], 0  ;;  %s166_s9 = smov [#allocation2]   ;;  %s94_s13 = scalar_lea.hbm %s228_s0, 256 }
   0x3   :  { %s15_s10 = sshll.u32 %s166_s9, 4  ;;  %p95_p0 = scmp.ne.s32.totalorder %s228_s0, %s94_s13  ;;  %s16_s10 = int_to_ptr.vmem [resolvable:$true] %s15_s10 }
   0x4   :  { %p98_p1 = scmp.lt.u32.totalorder %s94_s13, %s228_s0 }
   0x6   :  { %p100_p2 = pnand %p98_p1, %p95_p0 }
   0x8   :  { %103 = shalt.err (!%p100_p2)
}
   0x9   :  { %s104_s18 = scalar_lea.vmem %s16_s10, 256  ;;  %p109_p4 = scmp.lt.s32.totalorder %s16_s10, %s16_s10 }
   0xa   :  { %p105_p3 = scmp.ne.s32.totalorder %s16_s10, %s104_s18  ;;  %p110_p5 = scmp.lt.s32.totalorder %s104_s18, %s104_s18 }
   0xc   :  { %p111_p6 = por %p110_p5, %p109_p4 }
   0xe   :  { %p112_p7 = pnand %p111_p6, %p105_p3 }
  0x10   :  { %115 = shalt.err (!%p112_p7)
}
  0x11   :  { %s167_s19 = smov 128   ;;  %s168_s20 = smov 8  }
  0x12   :  { %21 = dma.hbm_to_vmem [thread:$0]  %s228_s0, 256, %s16_s10, [#allocation3], %s167_s19, %s167_s19, %s168_s20  }
  0x13   :  { %s169_s23 = smov [#allocation5]   ;;  %s116_s27 = scalar_lea.hbm %s229_s1, 16 }
  0x14   :  { %s28_s24 = sshll.u32 %s169_s23, 4  ;;  %p117_p8 = scmp.ne.s32.totalorder %s229_s1, %s116_s27  ;;  %s29_s24 = int_to_ptr.vmem [resolvable:$true] %s28_s24 }
  0x15   :  { %p120_p9 = scmp.lt.u32.totalorder %s116_s27, %s229_s1 }
  0x17   :  { %p122_p10 = pnand %p120_p9, %p117_p8 }
  0x19   :  { %125 = shalt.err (!%p122_p10)
}
  0x1a   :  { %s126_s4 = scalar_lea.vmem %s29_s24, 16  ;;  %s130_s0 = scalar_lea.vmem %s29_s24, 32 }
  0x1b   :  { %p127_p11 = scmp.ne.s32.totalorder %s29_s24, %s126_s4  ;;  %p131_p12 = scmp.lt.s32.totalorder %s29_s24, %s29_s24 }
  0x1c   :  { %p132_p13 = scmp.lt.s32.totalorder %s130_s0, %s126_s4 }
  0x1e   :  { %p133_p0 = por %p132_p13, %p131_p12 }
  0x20   :  { %p134_p1 = pnand %p133_p0, %p127_p11 }
  0x22   :  { %137 = shalt.err (!%p134_p1)
}
  0x23   :  { %31 = dma.hbm_to_vmem [thread:$0]  %s229_s1, 16, %s29_s24, [#allocation6]  }
  0x24   :  { %160 = dma.done.wait [#allocation3], 256  }
  0x25   :  { %161 = vsyncadd [#allocation3], 4294967040 }
  0x26   :  { %162 = dma.done.wait [#allocation6], 16  }
  0x27   :  { %163 = vsyncadd [#allocation6], 4294967280  ;;  %v38_v0 = vld [vmem:[#allocation2] sm:$0xff]  ;;  %v39_v1 = vld [vmem:[#allocation2 + $0x8] sm:$0xff]  ;;  %s170_s1 = smov [#allocation7]  }
  0x28   :  { %v40_v2 = vmul.f32 %v38_v0, %v38_v0  ;;  %v41_v3 = vmul.f32 %v39_v1, %v39_v1  ;;  %v84_v11 = vld [vmem:[#allocation5] ss:$0 sm:$0xff]  ;;  %s71_s7 = sshll.u32 %s170_s1, 4  ;;  %s72_s7 = int_to_ptr.vmem [resolvable:$true] %s71_s7 }
  0x29   :  { %s138_s8 = scalar_lea.vmem %s72_s7, 256  ;;  %p143_p3 = scmp.lt.s32.totalorder %s72_s7, %s72_s7 }
  0x2a   :  { %42 = vadd.xlane.f32.xlu0 %v40_v2  ;;  %p139_p2 = scmp.ne.s32.totalorder %s72_s7, %s138_s8  ;;  %p144_p4 = scmp.lt.s32.totalorder %s138_s8, %s138_s8 }
  0x2c   :  { %p145_p5 = por %p144_p4, %p143_p3 }
  0x2e   :  { %44 = vadd.xlane.f32.xlu0 %v41_v3  ;;  %p146_p6 = pnand %p145_p5, %p139_p2 }
  0xb7   :  { %v43_v4 = vpop.xlane.xlu0 %42 }
  0xb8   :  { %v47_v5 = vmul.f32 0.0078125, %v43_v4 }
  0xba   :  { %v49_v6 = vadd.f32 1e-05, %v47_v5 }
  0xbb   :  { %v45_v7 = vpop.xlane.xlu0 %44 }
  0xbc   :  { %90 = vrsqrt.f32 %v49_v6  ;;  %v48_v8 = vmul.f32 0.0078125, %v45_v7 }
  0xbe   :  { %v50_v9 = vadd.f32 1e-05, %v48_v8 }
  0xc0   :  { %92 = vrsqrt.f32 %v50_v9 }
  0xc6   :  { %v91_v10 = vpop.eup %90 }
  0xc7   :  { %v54_v12 = vmul.f32 %v91_v10, %v38_v0 }
  0xc9   :  { %v62_v13 = vmul.f32 %v84_v11, %v54_v12 }
  0xca   :  { %v93_v14 = vpop.eup %92 }
  0xcb   :  { %v55_v15 = vmul.f32 %v93_v14, %v39_v1  ;;  %64 = vst [vmem:[#allocation7] sm:$0xff] %v62_v13 }
  0xcd   :  { %v63_v16 = vmul.f32 %v84_v11, %v55_v15 }
  0xcf   :  { %65 = vst [vmem:[#allocation7 + $0x8] sm:$0xff] %v63_v16 }
  0xd0   :  { %149 = shalt.err (!%p146_p6)
}
  0xd1   :  { %s150_s11 = scalar_lea.hbm %s230_s2, 256 }
  0xd2   :  { %p151_p7 = scmp.ne.s32.totalorder %s230_s2, %s150_s11  ;;  %p154_p8 = scmp.lt.u32.totalorder %s150_s11, %s230_s2 }
  0xd4   :  { %p156_p9 = pnand %p154_p8, %p151_p7 }
  0xd6   :  { %159 = shalt.err (!%p156_p9)
}
  0xd7   :  { %77 = dma.vmem_to_hbm [thread:$0]  %s72_s7, 256, %s230_s2, [#allocation4], %s167_s19, %s167_s19, %s168_s20  }
  0xd8   :  { %164 = dma.done.wait [#allocation4], 256  }
  0xd9   :  { %165 = vsyncadd [#allocation4], 4294967040 }
  0xda   :  { %81 = vsyncpa [#allocation3], 1 }
  0xdb   :  { %82 = vsyncpa [#allocation6], 1 }
  0xdc   :  { %83 = vsyncpa [#allocation4], 1 }

</bundles_post_ra>
